<compile_context>
chip_gen: v5e
topology: v5e:2x2
jax: 0.10.0
libtpu: 0.0.40
codegen_flags: <defaults>
</compile_context>

<pallas_src>
import functools

import jax
import jax.numpy as jnp
from jax.experimental import pallas as pl
from jax.experimental.pallas import tpu as pltpu


def _round_up(n: int, m: int) -> int:
    return ((n + m - 1) // m) * m


def _pad2(a, rows: int, cols: int):
    return jnp.pad(a, ((0, rows - a.shape[0]), (0, cols - a.shape[1])))


def _pad1(a, n: int):
    return jnp.pad(a, ((0, n - a.shape[0]),))


def _vargru_gates_kernel(x_ref, h_ref, urz_ref, whT_ref, uhT_ref, brz_ref,
                         bh_ref, out_ref, *, use_gate_bias: bool, hp: int):
    """One batch-tile of VarGru with matmul gates (gru1 / gru2).

    x_ref   : (tb, Ip)     bfloat16
    h_ref   : (tb, Hp)     float32
    urz_ref : (Hp, 2*Hp)   bfloat16   ([Ur | Uz] fused, used as h @ Urz)
    whT_ref : (Ip, Hp)     bfloat16   (= Wh.T)
    uhT_ref : (Hp, Hp)     bfloat16   (= Uh.T)
    brz_ref : (1, 2*Hp)    float32    ([br | bz] fused)
    bh_ref  : (1, Hp)      float32
    out_ref : (tb, Hp)     float32
    """
    x = x_ref[...]                                # bf16
    h = h_ref[...]                                # f32 (blend needs f32)
    h_bf = h.astype(jnp.bfloat16)

    # Independent of the gates: issue first so this MXU pass overlaps the
    # EUP sigmoid of r/z below.
    cand_x = jnp.dot(x, whT_ref[...], preferred_element_type=jnp.float32)

    # Fused wide gate matmul: one MXU op with N = 2*Hp lanes.
    gates = jnp.dot(h_bf, urz_ref[...], preferred_element_type=jnp.float32)
    if use_gate_bias:                             # gru1
        gates = gates + brz_ref[...]
    rz = jax.nn.sigmoid(gates)                    # f32 elementwise (EUP)
    r = rz[:, :hp]
    z = rz[:, hp:]

    rh = (r * h).astype(jnp.bfloat16)
    h_tilde = jnp.tanh(
        cand_x
        + jnp.dot(rh, uhT_ref[...], preferred_element_type=jnp.float32)
        + bh_ref[...])
    out_ref[...] = h + z * (h_tilde - h)          # == (1-z)*h + z*h_tilde


def _vargru_biasgate_kernel(x_ref, h_ref, whT_ref, uhT_ref, brz_ref, bh_ref,
                            out_ref, *, hp: int):
    """One batch-tile of VarGru for gru_type='other': r/z = sigmoid(bias).

    No Urz weight is passed at all -> no gate matmul, no (Hp, 2Hp) DMA.
    """
    x = x_ref[...]
    h = h_ref[...]

    cand_x = jnp.dot(x, whT_ref[...], preferred_element_type=jnp.float32)

    rz = jax.nn.sigmoid(brz_ref[...])             # (1, 2*Hp), batch-invariant
    r = rz[:, :hp]
    z = rz[:, hp:]

    rh = (r * h).astype(jnp.bfloat16)             # r broadcasts over batch
    h_tilde = jnp.tanh(
        cand_x
        + jnp.dot(rh, uhT_ref[...], preferred_element_type=jnp.float32)
        + bh_ref[...])
    out_ref[...] = h + z * (h_tilde - h)


def prepare_vargru_params(params, input_size: int, hidden_size: int):
    """Hoisted, per-model param prep: fuse Ur|Uz, transpose Wh/Uh, pad to
    (8,128)-friendly shapes, cast matmul weights to bf16. Call once; reuse
    across timesteps."""
    Hp = _round_up(max(hidden_size, 128), 128)
    Ip = _round_up(max(input_size, 128), 128)
    Ur, Uz, br, bz, Wh, Uh, bh = (params[k] for k in
                                  ("Ur", "Uz", "br", "bz", "Wh", "Uh", "bh"))
    urz = jnp.concatenate(
        [_pad2(Ur, Hp, Hp), _pad2(Uz, Hp, Hp)], axis=1).astype(jnp.bfloat16)
    whT = _pad2(Wh.T, Ip, Hp).astype(jnp.bfloat16)
    uhT = _pad2(Uh.T, Hp, Hp).astype(jnp.bfloat16)
    brz = jnp.concatenate(
        [_pad1(br, Hp), _pad1(bz, Hp)]).reshape(1, 2 * Hp).astype(jnp.float32)
    bh2 = _pad1(bh, Hp).reshape(1, Hp).astype(jnp.float32)
    return {"urz": urz, "whT": whT, "uhT": uhT, "brz": brz, "bh": bh2,
            "H": hidden_size, "I": input_size, "Hp": Hp, "Ip": Ip}


def vargru_cell(x, h, prep, gru_type: str = "gru1"):
    """Single VarGru step using prepared params (see prepare_vargru_params)."""
    B = x.shape[0]
    H, I, Hp, Ip = prep["H"], prep["I"], prep["Hp"], prep["Ip"]

    # Batch (M) tiling: sublane-multiple, cap tile at 128 rows.
    Bp = _round_up(B, 8)
    if Bp > 128:
        tb = 128
        Bp = _round_up(Bp, tb)
    else:
        tb = Bp
    nb = Bp // tb

    x_p = jnp.pad(x, ((0, Bp - B), (0, Ip - I))).astype(jnp.bfloat16)
    h_p = jnp.pad(h, ((0, Bp - B), (0, Hp - H))).astype(jnp.float32)

    use_gates = gru_type in ("gru1", "gru2")

    # VMEM budget estimate (double-buffered activations, resident weights).
    w_bytes = (Ip * Hp + Hp * Hp) * 2 + (3 * Hp) * 4
    if use_gates:
        w_bytes += Hp * 2 * Hp * 2
    act_bytes = tb * Ip * 2 + 2 * tb * Hp * 4
    vmem_limit = int(min(64 * 1024 * 1024,
                         max(32 * 1024 * 1024,
                             2 * (w_bytes + act_bytes) + (4 << 20))))

    if use_gates:
        flops = 2 * Bp * Hp * (3 * Hp + Ip)
        trans = 3 * Bp * Hp
    else:
        flops = 2 * Bp * Hp * (Hp + Ip)
        trans = Bp * Hp + 2 * Hp
    bytes_accessed = (x_p.size * 2 + h_p.size * 4 + w_bytes + Bp * Hp * 4)
    cost = pl.CostEstimate(flops=flops, transcendentals=trans,
                           bytes_accessed=int(bytes_accessed))

    # Common specs.
    x_spec = pl.BlockSpec((tb, Ip), lambda i: (i, 0))
    h_spec = pl.BlockSpec((tb, Hp), lambda i: (i, 0))
    # Weights/biases: constant index_map -> stay resident in VMEM across
    # batch tiles (and across timesteps in a scan).
    whT_spec = pl.BlockSpec((Ip, Hp), lambda i: (0, 0))
    uhT_spec = pl.BlockSpec((Hp, Hp), lambda i: (0, 0))
    brz_spec = pl.BlockSpec((1, 2 * Hp), lambda i: (0, 0))
    bh_spec = pl.BlockSpec((1, Hp), lambda i: (0, 0))
    out_spec = pl.BlockSpec((tb, Hp), lambda i: (i, 0))

    if use_gates:
        kernel = functools.partial(_vargru_gates_kernel,
                                   use_gate_bias=(gru_type == "gru1"), hp=Hp)
        in_specs = [x_spec, h_spec,
                    pl.BlockSpec((Hp, 2 * Hp), lambda i: (0, 0)),  # [Ur | Uz]
                    whT_spec, uhT_spec, brz_spec, bh_spec]
        args = (x_p, h_p, prep["urz"], prep["whT"], prep["uhT"],
                prep["brz"], prep["bh"])
    else:
        kernel = functools.partial(_vargru_biasgate_kernel, hp=Hp)
        in_specs = [x_spec, h_spec, whT_spec, uhT_spec, brz_spec, bh_spec]
        args = (x_p, h_p, prep["whT"], prep["uhT"], prep["brz"], prep["bh"])

    grid_spec = pltpu.PrefetchScalarGridSpec(
        num_scalar_prefetch=0,
        grid=(nb,),
        in_specs=in_specs,
        out_specs=out_spec,
    )

    out_p = pl.pallas_call(
        kernel,
        out_shape=jax.ShapeDtypeStruct((Bp, Hp), jnp.float32),
        grid_spec=grid_spec,
        compiler_params=pltpu.CompilerParams(
            dimension_semantics=("parallel",),   # batch tiles split across TCs
            vmem_limit_bytes=vmem_limit,
        ),
        cost_estimate=cost,
    )(*args)

    return out_p[:B, :H]


def vargru_forward(x, h, params, gru_type: str = "gru1"):
    """One-shot wrapper: prep + single cell step (matches VarGru.forward)."""
    prep = prepare_vargru_params(params, x.shape[1], h.shape[1])
    return vargru_cell(x, h, prep, gru_type=gru_type)


def init_vargru_params(key, input_size, hidden_size):
    """xavier_uniform for 2-D weights, zeros for biases (VarGru.reset_parameters)."""
    def xavier(k, shape):
        fan_out, fan_in = shape  # torch Linear-style (out, in) convention
        bound = jnp.sqrt(6.0 / (fan_in + fan_out))
        return jax.random.uniform(k, shape, jnp.float32, -bound, bound)

    k1, k2, k3, k4 = jax.random.split(key, 4)
    return {
        "Ur": xavier(k1, (hidden_size, hidden_size)),
        "Uz": xavier(k2, (hidden_size, hidden_size)),
        "Wh": xavier(k3, (hidden_size, input_size)),
        "Uh": xavier(k4, (hidden_size, hidden_size)),
        "br": jnp.zeros((hidden_size,), jnp.float32),
        "bz": jnp.zeros((hidden_size,), jnp.float32),
        "bh": jnp.zeros((hidden_size,), jnp.float32),
    }


def vargru_reference(x, h, params, gru_type="gru1"):
    """Pure-JAX f32 reference mirroring the PyTorch forward exactly."""
    Ur, Uz, br, bz, Wh, Uh, bh = (params[k] for k in
                                  ("Ur", "Uz", "br", "bz", "Wh", "Uh", "bh"))
    if gru_type == "gru1":
        r = jax.nn.sigmoid(h @ Ur + br)
        z = jax.nn.sigmoid(h @ Uz + bz)
    elif gru_type == "gru2":
        r = jax.nn.sigmoid(h @ Ur)
        z = jax.nn.sigmoid(h @ Uz)
    else:
        r = jax.nn.sigmoid(br)
        z = jax.nn.sigmoid(bz)
    h_tilde = jnp.tanh(x @ Wh.T + (r * h) @ Uh.T + bh)
    return (1.0 - z) * h + z * h_tilde


if __name__ == "__main__":
    B, INPUT, HIDDEN = 4, 16, 32

    key = jax.random.PRNGKey(0)
    kp, kx, kh = jax.random.split(key, 3)
    params = init_vargru_params(kp, INPUT, HIDDEN)
    x = jax.random.normal(kx, (B, INPUT), jnp.float32)
    h = jax.random.normal(kh, (B, HIDDEN), jnp.float32)

    prep = prepare_vargru_params(params, INPUT, HIDDEN)

    ok = True
    for gtype in ("gru1", "gru2", "other"):
        out = vargru_cell(x, h, prep, gru_type=gtype)
        out = jax.block_until_ready(out)
        ref = vargru_reference(x, h, params, gru_type=gtype)
        # bf16 matmul inputs with f32 accumulation -> loosen tolerance vs f32 ref.
        if not jnp.allclose(out, ref, atol=5e-2, rtol=5e-2):
            ok = False
            print(f"MISMATCH for type={gtype}: "
                  f"max err {jnp.max(jnp.abs(out - ref))}")

    if ok:
        print("KERNEL_OK")
</pallas_src>

<mosaic_0001>
module attributes {stable_mosaic.version = 11 : i64} {
  func.func @_vargru_gates_kernel(%arg0: i32, %arg1: memref<8x128xbf16, #tpu.memory_space<vmem>>, %arg2: memref<8x128xf32, #tpu.memory_space<vmem>>, %arg3: memref<128x256xbf16, #tpu.memory_space<vmem>>, %arg4: memref<128x128xbf16, #tpu.memory_space<vmem>>, %arg5: memref<128x128xbf16, #tpu.memory_space<vmem>>, %arg6: memref<1x256xf32, #tpu.memory_space<vmem>>, %arg7: memref<1x128xf32, #tpu.memory_space<vmem>>, %arg8: memref<8x128xf32, #tpu.memory_space<vmem>>) attributes {dimension_semantics = [#tpu.dimension_semantics<parallel>], iteration_bounds = array<i64: 1>, scalar_prefetch = 0 : i64, scratch_operands = 0 : i64, tpu.core_type = #tpu.core_type<tc>, window_params = [{transform_indices = @transform_0, window_bounds = array<i64: 8, 128>}, {transform_indices = @transform_1, window_bounds = array<i64: 8, 128>}, {pipeline_mode = #tpu.pipeline_mode<synchronous>, transform_indices = @transform_2, window_bounds = array<i64: 128, 256>}, {pipeline_mode = #tpu.pipeline_mode<synchronous>, transform_indices = @transform_3, window_bounds = array<i64: 128, 128>}, {pipeline_mode = #tpu.pipeline_mode<synchronous>, transform_indices = @transform_4, window_bounds = array<i64: 128, 128>}, {pipeline_mode = #tpu.pipeline_mode<synchronous>, transform_indices = @transform_5, window_bounds = array<i64: 1, 256>}, {pipeline_mode = #tpu.pipeline_mode<synchronous>, transform_indices = @transform_6, window_bounds = array<i64: 1, 128>}, {transform_indices = @transform_7, window_bounds = array<i64: 8, 128>}]} {
    %c0 = arith.constant 0 : index
    %c0_0 = arith.constant 0 : index
    %0 = vector.load %arg1[%c0, %c0_0] : memref<8x128xbf16, #tpu.memory_space<vmem>>, vector<8x128xbf16>
    %c0_1 = arith.constant 0 : index
    %c0_2 = arith.constant 0 : index
    %1 = vector.load %arg2[%c0_1, %c0_2] : memref<8x128xf32, #tpu.memory_space<vmem>>, vector<8x128xf32>
    %2 = arith.truncf %1 : vector<8x128xf32> to vector<8x128xbf16>
    %c0_3 = arith.constant 0 : index
    %c0_4 = arith.constant 0 : index
    %3 = vector.load %arg4[%c0_3, %c0_4] : memref<128x128xbf16, #tpu.memory_space<vmem>>, vector<128x128xbf16>
    %cst = arith.constant dense<0.000000e+00> : vector<8x128xf32>
    %4 = tpu.matmul %0, %3, %cst {dimension_numbers = #tpu.dot_dimension_numbers<[1], [0], [0], [1], [0, 0, 1, 1], [], []>} : vector<8x128xbf16>, vector<128x128xbf16>, vector<8x128xf32> -> vector<8x128xf32>
    %c0_5 = arith.constant 0 : index
    %c0_6 = arith.constant 0 : index
    %5 = vector.load %arg3[%c0_5, %c0_6] : memref<128x256xbf16, #tpu.memory_space<vmem>>, vector<128x256xbf16>
    %cst_7 = arith.constant dense<0.000000e+00> : vector<8x256xf32>
    %6 = tpu.matmul %2, %5, %cst_7 {dimension_numbers = #tpu.dot_dimension_numbers<[1], [0], [0], [1], [0, 0, 1, 1], [], []>} : vector<8x128xbf16>, vector<128x256xbf16>, vector<8x256xf32> -> vector<8x256xf32>
    %c0_8 = arith.constant 0 : index
    %c0_9 = arith.constant 0 : index
    %7 = vector.load %arg6[%c0_8, %c0_9] : memref<1x256xf32, #tpu.memory_space<vmem>>, vector<1x256xf32>
    %8 = vector.broadcast %7 : vector<1x256xf32> to vector<8x256xf32>
    %9 = arith.addf %6, %8 : vector<8x256xf32>
    %10 = arith.negf %9 : vector<8x256xf32>
    %11 = math.exp %10 : vector<8x256xf32>
    %cst_10 = arith.constant 1.000000e+00 : f32
    %12 = vector.broadcast %cst_10 : f32 to vector<8x256xf32>
    %13 = arith.addf %12, %11 : vector<8x256xf32>
    %14 = arith.divf %12, %13 : vector<8x256xf32>
    %15 = vector.extract_strided_slice %14 {offsets = [0, 0], sizes = [8, 128], strides = [1, 1]} : vector<8x256xf32> to vector<8x128xf32>
    %16 = vector.extract_strided_slice %14 {offsets = [0, 128], sizes = [8, 128], strides = [1, 1]} : vector<8x256xf32> to vector<8x128xf32>
    %17 = arith.mulf %15, %1 : vector<8x128xf32>
    %18 = arith.truncf %17 : vector<8x128xf32> to vector<8x128xbf16>
    %c0_11 = arith.constant 0 : index
    %c0_12 = arith.constant 0 : index
    %19 = vector.load %arg5[%c0_11, %c0_12] : memref<128x128xbf16, #tpu.memory_space<vmem>>, vector<128x128xbf16>
    %cst_13 = arith.constant dense<0.000000e+00> : vector<8x128xf32>
    %20 = tpu.matmul %18, %19, %cst_13 {dimension_numbers = #tpu.dot_dimension_numbers<[1], [0], [0], [1], [0, 0, 1, 1], [], []>} : vector<8x128xbf16>, vector<128x128xbf16>, vector<8x128xf32> -> vector<8x128xf32>
    %21 = arith.addf %4, %20 : vector<8x128xf32>
    %c0_14 = arith.constant 0 : index
    %c0_15 = arith.constant 0 : index
    %22 = vector.load %arg7[%c0_14, %c0_15] : memref<1x128xf32, #tpu.memory_space<vmem>>, vector<1x128xf32>
    %23 = vector.broadcast %22 : vector<1x128xf32> to vector<8x128xf32>
    %24 = arith.addf %21, %23 : vector<8x128xf32>
    %25 = math.tanh %24 : vector<8x128xf32>
    %26 = arith.subf %25, %1 : vector<8x128xf32>
    %27 = arith.mulf %16, %26 : vector<8x128xf32>
    %28 = arith.addf %1, %27 : vector<8x128xf32>
    %c0_16 = arith.constant 0 : index
    %c0_17 = arith.constant 0 : index
    %29 = vector.load %arg8[%c0_16, %c0_17] : memref<8x128xf32, #tpu.memory_space<vmem>>, vector<8x128xf32>
    tpu.vector_store %arg8[%c0_16, %c0_17], %28 {strides = array<i32>} : memref<8x128xf32, #tpu.memory_space<vmem>>, vector<8x128xf32>,
    return
  }
  func.func @transform_0(%arg0: i32) -> (i32, i32) {
    %c0_i32 = arith.constant 0 : i32
    %c0_i32_0 = arith.constant 0 : i32
    return %arg0, %c0_i32 : i32, i32
  }
  func.func @transform_1(%arg0: i32) -> (i32, i32) {
    %c0_i32 = arith.constant 0 : i32
    %c0_i32_0 = arith.constant 0 : i32
    return %arg0, %c0_i32 : i32, i32
  }
  func.func @transform_2(%arg0: i32) -> (i32, i32) {
    %c0_i32 = arith.constant 0 : i32
    %c0_i32_0 = arith.constant 0 : i32
    %c0_i32_1 = arith.constant 0 : i32
    return %c0_i32, %c0_i32_0 : i32, i32
  }
  func.func @transform_3(%arg0: i32) -> (i32, i32) {
    %c0_i32 = arith.constant 0 : i32
    %c0_i32_0 = arith.constant 0 : i32
    %c0_i32_1 = arith.constant 0 : i32
    return %c0_i32, %c0_i32_0 : i32, i32
  }
  func.func @transform_4(%arg0: i32) -> (i32, i32) {
    %c0_i32 = arith.constant 0 : i32
    %c0_i32_0 = arith.constant 0 : i32
    %c0_i32_1 = arith.constant 0 : i32
    return %c0_i32, %c0_i32_0 : i32, i32
  }
  func.func @transform_5(%arg0: i32) -> (i32, i32) {
    %c0_i32 = arith.constant 0 : i32
    %c0_i32_0 = arith.constant 0 : i32
    %c0_i32_1 = arith.constant 0 : i32
    return %c0_i32, %c0_i32_0 : i32, i32
  }
  func.func @transform_6(%arg0: i32) -> (i32, i32) {
    %c0_i32 = arith.constant 0 : i32
    %c0_i32_0 = arith.constant 0 : i32
    %c0_i32_1 = arith.constant 0 : i32
    return %c0_i32, %c0_i32_0 : i32, i32
  }
  func.func @transform_7(%arg0: i32) -> (i32, i32) {
    %c0_i32 = arith.constant 0 : i32
    %c0_i32_0 = arith.constant 0 : i32
    return %arg0, %c0_i32 : i32, i32
  }
}

</mosaic_0001>

<bundles_post_ra>
// kernel: tpu_custom_call.1
= control target key start
LH: loop header
LB: loop body
LE: loop exit
PB: predicated region body
PF: predicated region fallthrough
CT: control target
= control target key end

     0   :  { %12 = vsyncpa [#allocation3], 0  ;;  %s871_s0 = inlined_call_operand.hbm [shape: bf16[8,128], index: 0, kind: input, shape index: {}]   ;;  %s872_s1 = inlined_call_operand.hbm [shape: f32[8,128], index: 1, kind: input, shape index: {}]   ;;  %s873_s2 = inlined_call_operand.hbm [shape: bf16[128,256], index: 2, kind: input, shape index: {}]   ;;  %s874_s3 = inlined_call_operand.hbm [shape: bf16[128,128], index: 3, kind: input, shape index: {}]   ;;  %s875_s4 = inlined_call_operand.hbm [shape: bf16[128,128], index: 4, kind: input, shape index: {}]   ;;  %s876_s5 = inlined_call_operand.vmem [shape: f32[1,256], index: 5, kind: input, shape index: {}]   ;;  %s877_s6 = inlined_call_operand.vmem [shape: f32[1,128], index: 6, kind: input, shape index: {}]   ;;  %s878_s7 = inlined_call_operand.hbm [shape: f32[8,128], index: 7, kind: output, shape index: {}]  }
   0x1   :  { %13 = vsyncpa [#allocation6], 0 }
   0x2   :  { %14 = vsyncpa [#allocation9], 0  ;;  %s32_s26 = sshll.u32 %s872_s1, 4  ;;  %s33_s26 = int_to_ptr.hbm [resolvable:$true] %s32_s26 }
   0x3   :  { %15 = vsyncpa [#allocation4], 0  ;;  %s790_s27 = smov [#allocation5]   ;;  %s55_s8 = sshll.u32 %s874_s3, 4  ;;  %s56_s8 = int_to_ptr.hbm [resolvable:$true] %s55_s8 }
   0x4   :  { %s34_s28 = sshll.u32 %s790_s27, 4  ;;  %s791_s9 = smov [#allocation8]   ;;  %s35_s28 = int_to_ptr.vmem [resolvable:$true] %s34_s28 }
   0x5   :  { %37 = dma.hbm_to_vmem [thread:$0]  %s33_s26, 128, %s35_s28, [#allocation6]  }
   0x6   :  { %s57_s10 = sshll.u32 %s791_s9, 4  ;;  %s792_s11 = smov 64   ;;  %s58_s10 = int_to_ptr.vmem [resolvable:$true] %s57_s10 }
   0x7   :  { %s793_s12 = smov 4   ;;  %s21_s1 = sshll.u32 %s871_s0, 4  ;;  %s22_s1 = int_to_ptr.hbm [resolvable:$true] %s21_s1 }
   0x8   :  { %63 = dma.hbm_to_vmem [thread:$0]  %s56_s8, 1024, %s58_s10, [#allocation9], %s792_s11, %s792_s11, %s793_s12  }
   0x9   :  { %s794_s15 = smov [#allocation2]   ;;  %s42_s3 = sshll.u32 %s873_s2, 4  ;;  %s43_s3 = int_to_ptr.hbm [resolvable:$true] %s42_s3 }
   0xa   :  { %s23_s16 = sshll.u32 %s794_s15, 4  ;;  %s795_s19 = smov [#allocation7]   ;;  %s24_s16 = int_to_ptr.vmem [resolvable:$true] %s23_s16 }
   0xb   :  { %26 = dma.hbm_to_vmem [thread:$0]  %s22_s1, 64, %s24_s16, [#allocation3]  }
   0xc   :  { %s44_s20 = sshll.u32 %s795_s19, 4  ;;  %s796_s21 = smov 128   ;;  %s45_s20 = int_to_ptr.vmem [resolvable:$true] %s44_s20 }
   0xd   :  { %s797_s22 = smov 8   ;;  %s68_s0 = sshll.u32 %s875_s4, 4  ;;  %s69_s0 = int_to_ptr.hbm [resolvable:$true] %s68_s0 }
   0xe   :  { %50 = dma.hbm_to_vmem [thread:$0]  %s43_s3, 2048, %s45_s20, [#allocation6], %s796_s21, %s796_s21, %s797_s22  }
   0xf   :  { %s798_s25 = smov [#allocation10]  }
  0x10   :  { %s70_s26 = sshll.u32 %s798_s25, 4  ;;  %s71_s26 = int_to_ptr.vmem [resolvable:$true] %s70_s26 }
  0x11   :  { %76 = dma.hbm_to_vmem [thread:$0]  %s69_s0, 1024, %s71_s26, [#allocation9], %s792_s11, %s792_s11, %s793_s12  }
  0x12   :  { %782 = dma.done.wait [#allocation3], 64  }
  0x13   :  { %783 = vsyncadd [#allocation3], 4294967232 }
  0x14   :  { %784 = dma.done.wait [#allocation6], 2176  }
  0x15   :  { %785 = vsyncadd [#allocation6], 4294965120 }
  0x16   :  { %786 = dma.done.wait [#allocation9], 2048  }
  0x17   :  { %787 = vsyncadd [#allocation9], 4294965248  ;;  %v513_v0 = vld [vmem:[#allocation7 + $0x70] sm:$0xf]  ;;  %v608_v1 = vld [vmem:[#allocation7 + $0x74] sm:$0xf0] }
  0x18   :  { %v505_v2 = vld [vmem:[#allocation7 + $0x60] sm:$0xf]  ;;  %v514_v3 = vor.u32 %v608_v1, %v513_v0  ;;  %v606_v4 = vld [vmem:[#allocation7 + $0x64] sm:$0xf0]  ;;  %v497_v6 = vld [vmem:[#allocation7 + $0x50] sm:$0xf] }
  0x19   :  { %v506_v5 = vor.u32 %v606_v4, %v505_v2  ;;  %v604_v7 = vld [vmem:[#allocation7 + $0x54] sm:$0xf0]  ;;  %v607_v8 = vld [vmem:[#allocation7 + $0x74] sm:$0xf]  ;;  %v515_v9 = vld [vmem:[#allocation7 + $0x78] sm:$0xf0] }
  0x1a   :  { %222 = vmatpush.bf16.msra.mxu0 %v514_v3  ;;  %v605_v10 = vld [vmem:[#allocation7 + $0x64] sm:$0xf]  ;;  %v507_v11 = vld [vmem:[#allocation7 + $0x68] sm:$0xf0]  ;;  %v498_v12 = vor.u32 %v604_v7, %v497_v6  ;;  %v518_v13 = vor.u32 %v607_v8, %v515_v9  ;;  %v489_v14 = vld [vmem:[#allocation7 + $0x40] sm:$0xf] }
  0x1b   :  { %v602_v15 = vld [vmem:[#allocation7 + $0x44] sm:$0xf0]  ;;  %v510_v16 = vor.u32 %v605_v10, %v507_v11  ;;  %v592_v17 = vld [vmem:[#allocation8 + $0x38] sm:$0xff]  ;;  %v603_v18 = vld [vmem:[#allocation7 + $0x54] sm:$0xf]  ;;  %s443_s8 = sshll.u32 %s878_s7, 4  ;;  %s444_s8 = int_to_ptr.hbm [resolvable:$true] %s443_s8 }
  0x1c   :  { %235 = vmatpush.bf16.msra.mxu1 %v518_v13  ;;  %v499_v19 = vld [vmem:[#allocation7 + $0x58] sm:$0xf0]  ;;  %v490_v20 = vor.u32 %v602_v15, %v489_v14  ;;  %413 = vmatpush.bf16.msra.mxu3 %v592_v17  ;;  %v481_v21 = vld [vmem:[#allocation7 + $0x30] sm:$0xf]  ;;  %v600_v22 = vld [vmem:[#allocation7 + $0x34] sm:$0xf0] }
  0x1d   :  { %v502_v23 = vor.u32 %v603_v18, %v499_v19  ;;  %v601_v24 = vld [vmem:[#allocation7 + $0x44] sm:$0xf]  ;;  %v491_v25 = vld [vmem:[#allocation7 + $0x48] sm:$0xf0]  ;;  %v482_v26 = vor.u32 %v600_v22, %v481_v21  ;;  %v473_v27 = vld [vmem:[#allocation7 + $0x20] sm:$0xf] }
  0x1e   :  { %223 = vmatpush.bf16.msra.mxu0 %v506_v5  ;;  %v598_v28 = vld [vmem:[#allocation7 + $0x24] sm:$0xf0]  ;;  %v494_v29 = vor.u32 %v601_v24, %v491_v25  ;;  %v599_v30 = vld [vmem:[#allocation7 + $0x34] sm:$0xf]  ;;  %v483_v31 = vld [vmem:[#allocation7 + $0x38] sm:$0xf0] }
  0x1f   :  { %v474_v32 = vor.u32 %v598_v28, %v473_v27  ;;  %v465_v33 = vld [vmem:[#allocation7 + $0x10] sm:$0xf]  ;;  %v596_v34 = vld [vmem:[#allocation7 + $0x14] sm:$0xf0]  ;;  %v486_v35 = vor.u32 %v599_v30, %v483_v31  ;;  %v457_v37 = vld [vmem:[#allocation7] sm:$0xf] }
  0x20   :  { %236 = vmatpush.bf16.msra.mxu1 %v510_v16  ;;  %v466_v36 = vor.u32 %v596_v34, %v465_v33  ;;  %v594_v38 = vld [vmem:[#allocation7 + $0x4] sm:$0xf0]  ;;  %v855_v40 = vld [vmem:[#allocation5] sm:$0xff]  ;;  %v597_v42 = vld [vmem:[#allocation7 + $0x24] sm:$0xf] }
  0x21   :  { %v458_v39 = vor.u32 %v594_v38, %v457_v37  ;;  %v103_v41 = vpack.c.bf16 %v855_v40, %v855_v40  ;;  %v475_v43 = vld [vmem:[#allocation7 + $0x28] sm:$0xf0]  ;;  %v591_v45 = vld [vmem:[#allocation8 + $0x30] sm:$0xff]  ;;  %v467_v47 = vld [vmem:[#allocation7 + $0x18] sm:$0xf0] }
  0x22   :  { %224 = vmatpush.bf16.msra.mxu0 %v498_v12  ;;  %v478_v44 = vor.u32 %v597_v42, %v475_v43  ;;  %414 = vmatpush.bf16.msra.mxu3 %v591_v45  ;;  %v595_v46 = vld [vmem:[#allocation7 + $0x14] sm:$0xf]  ;;  %v616_v49 = vld [vmem:[#allocation10 + $0x38] sm:$0xff]  ;;  %v590_v50 = vld [vmem:[#allocation8 + $0x28] sm:$0xff] }
  0x23   :  { %v470_v48 = vor.u32 %v595_v46, %v467_v47  ;;  %352 = vmatpush.bf16.msra.mxu2 %v616_v49  ;;  %v593_v51 = vld [vmem:[#allocation7 + $0x4] sm:$0xf]  ;;  %v459_v52 = vld [vmem:[#allocation7 + $0x8] sm:$0xf0]  ;;  %v615_v54 = vld [vmem:[#allocation10 + $0x30] sm:$0xff] }
  0x24   :  { %237 = vmatpush.bf16.msra.mxu1 %v502_v23  ;;  %v462_v53 = vor.u32 %v593_v51, %v459_v52  ;;  %v589_v55 = vld [vmem:[#allocation8 + $0x20] sm:$0xff]  ;;  %v614_v56 = vld [vmem:[#allocation10 + $0x28] sm:$0xff]  ;;  %v588_v57 = vld [vmem:[#allocation8 + $0x18] sm:$0xff] }
  0x25   :  { %v613_v58 = vld [vmem:[#allocation10 + $0x20] sm:$0xff]  ;;  %v587_v59 = vld [vmem:[#allocation8 + $0x10] sm:$0xff]  ;;  %v612_v60 = vld [vmem:[#allocation10 + $0x18] sm:$0xff] }
  0x26   :  { %225 = vmatpush.bf16.msra.mxu0 %v490_v20  ;;  %415 = vmatpush.bf16.msra.mxu3 %v590_v50  ;;  %v586_v61 = vld [vmem:[#allocation8 + $0x8] sm:$0xff]  ;;  %v611_v62 = vld [vmem:[#allocation10 + $0x10] sm:$0xff]  ;;  %v585_v63 = vld [vmem:[#allocation8] sm:$0xff] }
  0x27   :  { %353 = vmatpush.bf16.msra.mxu2 %v615_v54  ;;  %v610_v0 = vld [vmem:[#allocation10 + $0x8] sm:$0xff]  ;;  %v101_v1 = vld [vmem:[#allocation2] sm:$0xf]  ;;  %v609_v3 = vld [vmem:[#allocation10] sm:$0xff] }
  0x28   :  { %238 = vmatpush.bf16.msra.mxu1 %v494_v29  ;;  %v136_v2 = vld [vmem:[%s876_s5] sm:$0x3] }
  0x29   :  { %v138_v4 = vperm.slane %v136_v2, 0  ;;  %v139_v25 = vperm.slane %v136_v2, 1 }
  0x2a   :  { %226 = vmatpush.bf16.msra.mxu0 %v482_v26  ;;  %416 = vmatpush.bf16.msra.mxu3 %v589_v55 }
  0x2b   :  { %354 = vmatpush.bf16.msra.mxu2 %v614_v56 }
  0x2c   :  { %239 = vmatpush.bf16.msra.mxu1 %v486_v35  ;;  %v627_v35 = vld [vmem:[%s877_s6] ss:$0 sm:$0xff]  ;;  %s799_s6 = smov [#allocation11]  }
  0x2d   :  { %s441_s28 = sshll.u32 %s799_s6, 4  ;;  %s442_s28 = int_to_ptr.vmem [resolvable:$true] %s441_s28 }
  0x2e   :  { %227 = vmatpush.bf16.msra.mxu0 %v474_v32  ;;  %417 = vmatpush.bf16.msra.mxu3 %v588_v57 }
  0x2f   :  { %355 = vmatpush.bf16.msra.mxu2 %v613_v58 }
  0x30   :  { %240 = vmatpush.bf16.msra.mxu1 %v478_v44 }
  0x32   :  { %228 = vmatpush.bf16.msra.mxu0 %v466_v36  ;;  %418 = vmatpush.bf16.msra.mxu3 %v587_v59 }
  0x33   :  { %356 = vmatpush.bf16.msra.mxu2 %v612_v60 }
  0x34   :  { %241 = vmatpush.bf16.msra.mxu1 %v470_v48 }
  0x36   :  { %229 = vmatpush.bf16.msra.mxu0 %v458_v39  ;;  %419 = vmatpush.bf16.msra.mxu3 %v586_v61 }
  0x37   :  { %357 = vmatpush.bf16.msra.mxu2 %v611_v62 }
  0x38   :  { %242 = vmatpush.bf16.msra.mxu1 %v462_v53 }
  0x39   :  { %230 = vmatmul.bf16.vlgmr.msra.gmra.mxu0 %v103_v41 }
  0x3a   :  { %420 = vmatpush.bf16.msra.mxu3 %v585_v63 }
  0x3b   :  { %243 = vmatmul.bf16.vlgmr.msra.gmra.mxu1 %v103_v41  ;;  %358 = vmatpush.bf16.msra.mxu2 %v610_v0 }
  0x3d   :  { %421 = vmatmul.bf16.vlgmr.msra.gmra.mxu3 %v101_v1 }
  0x3f   :  { %359 = vmatpush.bf16.msra.mxu2 %v609_v3 }
  0xb6   :  { %v231_v5 = vpop.f32.mrf.mxu0 }
  0xb7   :  { %v232_v6 = vadd.f32 %v231_v5, %v138_v4 }
  0xb8   :  { %v244_v23 = vpop.f32.mrf.mxu1 }
  0xb9   :  { %v519_v7 = vmul.f32 -1.442695, %v232_v6  ;;  %v245_v27 = vadd.f32 %v244_v23, %v139_v25 }
  0xbb   :  { %628 = vpow2.f32 %v519_v7  ;;  %v520_v28 = vmul.f32 -1.442695, %v245_v27 }
  0xbe   :  { %v233_v8 = vpop.f32.mrf.mxu0 }
  0xc0   :  { %v246_v24 = vpop.f32.mrf.mxu1  ;;  %v422_v26 = vpop.f32.mrf.mxu3 }
  0xc1   :  { %v629_v9 = vpop.eup %628 }
  0xc2   :  { %v254_v10 = vadd.f32 1.0, %v629_v9 }
  0xc4   :  { %630 = vrcp.f32 %v254_v10  ;;  %v267_v14 = vand.u32 2147483648, %v254_v10  ;;  %v265_v16 = vand.u32 2147483647, %v254_v10  ;;  %vm261_vm1 = vweird.f32 %v254_v10 }
  0xc5   :  { %632 = vpow2.f32 %v520_v28 }
  0xc6   :  { %v268_v18 = vor.u32 1.1754944e-38, %v267_v14  ;;  %vm266_vm3 = vcmp.eq.f32.partialorder %v265_v16, 8.507059e+37 }
  0xc8   :  { %v424_v29 = vpop.f32.mrf.mxu3 }
  0xca   :  { %v631_v11 = vpop.eup %630 }
  0xcb   :  { %v257_v12 = vmul.f32 %v631_v11, %v254_v10  ;;  %vm262_vm0 = vweird.f32 %v631_v11  ;;  %v633_v30 = vpop.eup %632 }
  0xcc   :  { %vm263_vm2 = vmor %vm261_vm1, %vm262_vm0  ;;  %v255_v31 = vadd.f32 1.0, %v633_v30 }
  0xcd   :  { %v258_v13 = vsub.f32 1.0, %v257_v12 }
  0xce   :  { %634 = vrcp.f32 %v255_v31  ;;  %vm276_vm4 = vweird.f32 %v255_v31  ;;  %v282_v41 = vand.u32 2147483648, %v255_v31  ;;  %v280_v43 = vand.u32 2147483647, %v255_v31 }
  0xcf   :  { %v259_v15 = vmul.f32 %v631_v11, %v258_v13 }
  0xd0   :  { %v283_v45 = vor.u32 1.1754944e-38, %v282_v41  ;;  %vm281_vm7 = vcmp.eq.f32.partialorder %v280_v43, 8.507059e+37 }
  0xd1   :  { %v260_v17 = vadd.f32 %v631_v11, %v259_v15 }
  0xd3   :  { %v264_v19 = vsel %vm263_vm2, %v631_v11, %v260_v17 }
  0xd4   :  { %v269_v20 = vsel %vm266_vm3, %v268_v18, %v264_v19  ;;  %v635_v32 = vpop.eup %634 }
  0xd5   :  { %v286_v21 = vmul.f32 %v269_v20, %v855_v40  ;;  %v272_v33 = vmul.f32 %v635_v32, %v255_v31  ;;  %vm277_vm5 = vweird.f32 %v635_v32 }
  0xd6   :  { %vm278_vm6 = vmor %vm276_vm4, %vm277_vm5 }
  0xd7   :  { %v287_v22 = vpack.c.bf16 %v286_v21, %v286_v21  ;;  %v273_v34 = vsub.f32 1.0, %v272_v33 }
  0xd9   :  { %360 = vmatmul.bf16.vlgmr.msra.gmra.mxu2 %v287_v22  ;;  %v274_v38 = vmul.f32 %v635_v32, %v273_v34 }
  0xdb   :  { %v275_v42 = vadd.f32 %v635_v32, %v274_v38 }
  0xdd   :  { %v279_v46 = vsel %vm278_vm6, %v635_v32, %v275_v42 }
  0xde   :  { %v284_v49 = vsel %vm281_vm7, %v283_v45, %v279_v46 }
 0x15c   :  { %v361_v36 = vpop.f32.mrf.mxu2 }
 0x15d   :  { %v423_v37 = vadd.f32 %v422_v26, %v361_v36 }
 0x15f   :  { %v430_v39 = vadd.f32 %v627_v35, %v423_v37 }
 0x161   :  { %636 = vtanh.f32 %v430_v39 }
 0x164   :  { %v363_v44 = vpop.f32.mrf.mxu2 }
 0x167   :  { %v637_v47 = vpop.eup %636 }
 0x168   :  { %v432_v48 = vsub.f32 %v637_v47, %v855_v40 }
 0x16a   :  { %v433_v50 = vmul.f32 %v432_v48, %v284_v49 }
 0x16c   :  { %v434_v51 = vadd.f32 %v433_v50, %v855_v40 }
 0x16e   :  { %435 = vst [vmem:[#allocation11] sm:$0xff] %v434_v51 }
 0x16f   :  { %446 = dma.vmem_to_hbm [thread:$0]  %s442_s28, 128, %s444_s8, [#allocation4]  }
 0x170   :  { %788 = dma.done.wait [#allocation4], 128  }
 0x171   :  { %789 = vsyncadd [#allocation4], 4294967168 }
 0x172   :  { %451 = vsyncpa [#allocation3], 1 }
 0x173   :  { %452 = vsyncpa [#allocation6], 1 }
 0x174   :  { %453 = vsyncpa [#allocation9], 1 }
 0x175   :  { %454 = vsyncpa [#allocation4], 1 }

</bundles_post_ra>
